<compile_context>
chip_gen: v7x
topology: tpu7x:2x2x1
jax: 0.10.0
libtpu: 0.0.40
codegen_flags: <defaults>
</compile_context>

<pallas_src>
import functools

import jax
import jax.numpy as jnp
from jax.experimental import pallas as pl
from jax.experimental.pallas import tpu as pltpu

ALPHA = 1.0
GAMMA = 2  # implemented as an explicit square below


def focal_loss_kernel(x_ref, t_ref, o_ref, *, n_rows, tm):
    # x_ref: (TM, C) logits block; t_ref: (TM, 1) int32 targets block;
    # o_ref: (8, 1) partial-sum block owned exclusively by this grid step.
    i = pl.program_id(0)

    x = x_ref[...].astype(jnp.float32)                       # (TM, C) f32 math
    t = t_ref[...]                                           # (TM, 1) int32

    # Numerically stable log-sum-exp over the class (lane) axis.
    m = jnp.max(x, axis=-1, keepdims=True)                   # (TM, 1)
    lse = m + jnp.log(jnp.sum(jnp.exp(x - m), axis=-1, keepdims=True))

    # Gather the target-class logit via a one-hot select (no dynamic gather on TPU).
    cls_ids = jax.lax.broadcasted_iota(jnp.int32, x.shape, dimension=1)
    tgt_logit = jnp.sum(jnp.where(cls_ids == t, x, 0.0), axis=-1, keepdims=True)

    ce = lse - tgt_logit                                      # (TM, 1)
    pt = jnp.exp(-ce)
    one_m_pt = 1.0 - pt
    f = ALPHA * one_m_pt * one_m_pt * ce                      # explicit square

    # Mask rows of the (padded) tail tile with a SELECT so garbage/NaN rows
    # contribute exactly 0 and cannot propagate.
    row_ids = jax.lax.broadcasted_iota(jnp.int32, f.shape, dimension=0) + i * tm
    f = jnp.where(row_ids < n_rows, f, 0.0)

    # Per-tile contribution to the mean (pre-divided by true N for precision).
    s = jnp.sum(f) / jnp.float32(n_rows)

    # Write the scalar into row 0 of this tile's private (8,1) output block,
    # zeros elsewhere; the wrapper sums all partials.
    sub = jax.lax.broadcasted_iota(jnp.int32, (8, 1), dimension=0)
    o_ref[...] = jnp.where(sub == 0, s, jnp.float32(0.0))


def _pick_tile(n, c, itemsize):
    # Size TM purely by bytes: ~4 MiB per in-flight logits buffer
    # (double-buffered -> ~8 MiB), no artificial row cap.
    budget = 4 * 1024 * 1024
    tm = budget // max(1, c * itemsize)
    tm = max(16, (tm // 16) * 16)        # multiple of 16 -> bf16-layout legal too
    tm = min(tm, 32768)                  # keep per-step vreg/iota work bounded
    n_pad = ((n + 15) // 16) * 16
    return min(tm, n_pad)


def focal_loss(inputs, targets, *, tm=None):
    """inputs: (N, C) float logits (f32 or bf16); targets: (N,) int class ids.

    Returns the scalar mean focal loss (alpha=1, gamma=2).
    """
    n, c = inputs.shape
    itemsize = jnp.dtype(inputs.dtype).itemsize
    if tm is None:
        tm = _pick_tile(n, c, itemsize)
    t2d = targets.astype(jnp.int32).reshape(n, 1)
    num_tiles = (n + tm - 1) // tm

    # Raise the scoped-VMEM limit only if the double-buffered tiles wouldn't
    # fit the smallest default (v5e 16 MiB); re-derived per call so a big tile
    # never silently overflows v7x's smaller VMEM.
    need = 2 * (tm * c * itemsize) + 2 * (tm * 4) + (1 << 20)
    vmem_limit = int(min(need + (4 << 20), 100 << 20)) if need > (16 << 20) else None

    kernel = functools.partial(focal_loss_kernel, n_rows=n, tm=tm)
    partials = pl.pallas_call(
        kernel,
        out_shape=jax.ShapeDtypeStruct((num_tiles * 8, 1), jnp.float32),
        grid_spec=pltpu.PrefetchScalarGridSpec(
            num_scalar_prefetch=0,
            grid=(num_tiles,),
            in_specs=[
                pl.BlockSpec((tm, c), lambda i: (i, 0)),
                pl.BlockSpec((tm, 1), lambda i: (i, 0)),
            ],
            # Each grid step owns its private (8,1) partial-sum block.
            out_specs=pl.BlockSpec((8, 1), lambda i: (i, 0)),
        ),
        compiler_params=pltpu.CompilerParams(
            # No carried accumulator -> batch-tile axis is independent and can
            # be sharded across TensorCores (v7x megacore); neutral on v5e/v6e.
            dimension_semantics=("parallel",),
            vmem_limit_bytes=vmem_limit,
        ),
    )(inputs, t2d)
    # Tiny final reduction over per-tile partials (already divided by N).
    return jnp.sum(partials)


def focal_loss_ref(inputs, targets):
    # Pure-JAX reference for sanity checking.
    x = inputs.astype(jnp.float32)
    lse = jax.scipy.special.logsumexp(x, axis=-1)
    tgt = jnp.take_along_axis(x, targets[:, None].astype(jnp.int32), axis=-1)[:, 0]
    ce = lse - tgt
    pt = jnp.exp(-ce)
    return jnp.mean(ALPHA * (1.0 - pt) ** 2 * ce)


if __name__ == "__main__":
    key = jax.random.PRNGKey(0)
    k1, k2, k3, k4 = jax.random.split(key, 4)

    # Small shape consistent with the module's forward: (N, C) logits + (N,) ids.
    N, C = 8, 32
    inputs = jax.random.normal(k1, (N, C), dtype=jnp.float32)
    targets = jax.random.randint(k2, (N,), 0, C, dtype=jnp.int32)

    out = jax.block_until_ready(focal_loss(inputs, targets))
    ref = focal_loss_ref(inputs, targets)
    assert jnp.allclose(out, ref, atol=1e-5, rtol=1e-5), (out, ref)

    # Streamed multi-tile path + ragged tail masking (N % TM != 0) + per-tile partials.
    N2, C2 = 50, 128
    inputs2 = jax.random.normal(k3, (N2, C2), dtype=jnp.float32)
    targets2 = jax.random.randint(k4, (N2,), 0, C2, dtype=jnp.int32)
    out2 = jax.block_until_ready(focal_loss(inputs2, targets2, tm=16))
    ref2 = focal_loss_ref(inputs2, targets2)
    assert jnp.allclose(out2, ref2, atol=1e-5, rtol=1e-5), (out2, ref2)

    # bf16-fed path (halves HBM bytes on bandwidth-bound v5e/v6e); math is f32 in-kernel.
    inputs2_bf16 = inputs2.astype(jnp.bfloat16)
    out3 = jax.block_until_ready(focal_loss(inputs2_bf16, targets2))
    ref3 = focal_loss_ref(inputs2_bf16.astype(jnp.float32), targets2)
    assert jnp.allclose(out3, ref3, atol=1e-4, rtol=1e-4), (out3, ref3)

    # TODO(synk): the logits=True branch (elementwise BCE-with-logits focal loss)
    # is not implemented; the module's default forward (softmax CE) is.
    print("KERNEL_OK")
</pallas_src>

<mosaic_0001>
module attributes {stable_mosaic.version = 11 : i64} {
  func.func @focal_loss_kernel(%arg0: i32, %arg1: memref<16x32xf32, #tpu.memory_space<vmem>>, %arg2: memref<16x1xi32, #tpu.memory_space<vmem>>, %arg3: memref<8x1xf32, #tpu.memory_space<vmem>>) attributes {dimension_semantics = [#tpu.dimension_semantics<parallel>], iteration_bounds = array<i64: 1>, scalar_prefetch = 0 : i64, scratch_operands = 0 : i64, tpu.core_type = #tpu.core_type<tc>, window_params = [{transform_indices = @transform_0, window_bounds = array<i64: 16, 32>}, {transform_indices = @transform_1, window_bounds = array<i64: 16, 1>}, {transform_indices = @transform_2, window_bounds = array<i64: 8, 1>}]} {
    %c0 = arith.constant 0 : index
    %c0_0 = arith.constant 0 : index
    %0 = vector.load %arg1[%c0, %c0_0] : memref<16x32xf32, #tpu.memory_space<vmem>>, vector<16x32xf32>
    %c0_1 = arith.constant 0 : index
    %c0_2 = arith.constant 0 : index
    %1 = vector.load %arg2[%c0_1, %c0_2] : memref<16x1xi32, #tpu.memory_space<vmem>>, vector<16x1xi32>
    %cst = arith.constant dense<0xFF800000> : vector<16xf32>
    %2 = vector.multi_reduction <maximumf>, %0, %cst [1] : vector<16x32xf32> to vector<16xf32>
    %3 = vector.shape_cast %2 : vector<16xf32> to vector<16x1xf32>
    %4 = vector.broadcast %3 : vector<16x1xf32> to vector<16x32xf32>
    %5 = arith.subf %0, %4 : vector<16x32xf32>
    %6 = math.exp %5 : vector<16x32xf32>
    %cst_3 = arith.constant dense<0.000000e+00> : vector<16xf32>
    %7 = vector.multi_reduction <add>, %6, %cst_3 [1] : vector<16x32xf32> to vector<16xf32>
    %8 = vector.shape_cast %7 : vector<16xf32> to vector<16x1xf32>
    %9 = math.log %8 : vector<16x1xf32>
    %10 = arith.addf %3, %9 : vector<16x1xf32>
    %11 = tpu.iota {dimensions = array<i32: 1>} : vector<16x32xi32>
    %12 = vector.broadcast %1 : vector<16x1xi32> to vector<16x32xi32>
    %13 = arith.cmpi eq, %11, %12 : vector<16x32xi32>
    %cst_4 = arith.constant 0.000000e+00 : f32
    %14 = vector.broadcast %cst_4 : f32 to vector<16x32xf32>
    %15 = arith.select %13, %0, %14 : vector<16x32xi1>, vector<16x32xf32>
    %cst_5 = arith.constant dense<0.000000e+00> : vector<16xf32>
    %16 = vector.multi_reduction <add>, %15, %cst_5 [1] : vector<16x32xf32> to vector<16xf32>
    %17 = vector.shape_cast %16 : vector<16xf32> to vector<16x1xf32>
    %18 = arith.subf %10, %17 : vector<16x1xf32>
    %cst_6 = arith.constant 0.000000e+00 : f32
    %19 = vector.broadcast %cst_6 : f32 to vector<16x1xf32>
    %20 = arith.subf %19, %18 : vector<16x1xf32>
    %21 = math.exp %20 : vector<16x1xf32>
    %cst_7 = arith.constant 1.000000e+00 : f32
    %22 = vector.broadcast %cst_7 : f32 to vector<16x1xf32>
    %23 = arith.subf %22, %21 : vector<16x1xf32>
    %cst_8 = arith.constant 1.000000e+00 : f32
    %24 = vector.broadcast %cst_8 : f32 to vector<16x1xf32>
    %25 = arith.mulf %24, %23 : vector<16x1xf32>
    %26 = arith.mulf %25, %23 : vector<16x1xf32>
    %27 = arith.mulf %26, %18 : vector<16x1xf32>
    %28 = tpu.iota {dimensions = array<i32: 0>} : vector<16x1xi32>
    %c16_i32 = arith.constant 16 : i32
    %29 = arith.muli %arg0, %c16_i32 : i32
    %30 = vector.broadcast %29 : i32 to vector<16x1xi32>
    %31 = arith.addi %28, %30 : vector<16x1xi32>
    %c8_i32 = arith.constant 8 : i32
    %32 = vector.broadcast %c8_i32 : i32 to vector<16x1xi32>
    %33 = arith.cmpi slt, %31, %32 : vector<16x1xi32>
    %cst_9 = arith.constant 0.000000e+00 : f32
    %34 = vector.broadcast %cst_9 : f32 to vector<16x1xf32>
    %35 = arith.select %33, %27, %34 : vector<16x1xi1>, vector<16x1xf32>
    %36 = vector.shape_cast %35 : vector<16x1xf32> to vector<1x16x1xf32>
    %cst_10 = arith.constant dense<0.000000e+00> : vector<1xf32>
    %37 = vector.multi_reduction <add>, %36, %cst_10 [1, 2] : vector<1x16x1xf32> to vector<1xf32>
    %38 = vector.shape_cast %37 : vector<1xf32> to vector<1x1x1xf32>
    %39 = vector.extract %38[0, 0, 0] : f32 from vector<1x1x1xf32>
    %cst_11 = arith.constant 8.000000e+00 : f32
    %40 = arith.divf %39, %cst_11 : f32
    %41 = tpu.iota {dimensions = array<i32: 0>} : vector<8x1xi32>
    %c0_i32 = arith.constant 0 : i32
    %42 = vector.broadcast %c0_i32 : i32 to vector<8x1xi32>
    %43 = arith.cmpi eq, %41, %42 : vector<8x1xi32>
    %cst_12 = arith.constant 0.000000e+00 : f32
    %44 = vector.broadcast %40 : f32 to vector<8x1xf32>
    %45 = vector.broadcast %cst_12 : f32 to vector<8x1xf32>
    %46 = arith.select %43, %44, %45 : vector<8x1xi1>, vector<8x1xf32>
    %c0_13 = arith.constant 0 : index
    %c0_14 = arith.constant 0 : index
    %47 = vector.load %arg3[%c0_13, %c0_14] : memref<8x1xf32, #tpu.memory_space<vmem>>, vector<8x1xf32>
    tpu.vector_store %arg3[%c0_13, %c0_14], %46 {strides = array<i32>} : memref<8x1xf32, #tpu.memory_space<vmem>>, vector<8x1xf32>,
    return
  }
  func.func @transform_0(%arg0: i32) -> (i32, i32) {
    %c0_i32 = arith.constant 0 : i32
    %c0_i32_0 = arith.constant 0 : i32
    return %arg0, %c0_i32 : i32, i32
  }
  func.func @transform_1(%arg0: i32) -> (i32, i32) {
    %c0_i32 = arith.constant 0 : i32
    %c0_i32_0 = arith.constant 0 : i32
    return %arg0, %c0_i32 : i32, i32
  }
  func.func @transform_2(%arg0: i32) -> (i32, i32) {
    %c0_i32 = arith.constant 0 : i32
    %c0_i32_0 = arith.constant 0 : i32
    return %arg0, %c0_i32 : i32, i32
  }
}

</mosaic_0001>

<bundles_post_ra>
// kernel: tpu_custom_call.1
= control target key start
LH: loop header
LB: loop body
LE: loop exit
PB: predicated region body
PF: predicated region fallthrough
CT: control target
= control target key end

     0   :  { %vm15_vm0 = vcmask 261120   ;;  %v117_v1 = vmov 0   ;;  %v40_v7 = vlaneseq  ;;  %vm83_vm2 = vcmask 7168   ;;  %s147_s0 = inlined_call_operand.vmem [shape: f32[8,32], index: 0, kind: input, shape index: {}]   ;;  %s148_s1 = inlined_call_operand.vmem [shape: s32[8,1], index: 1, kind: input, shape index: {}]   ;;  %s149_s2 = inlined_call_operand.vmem [shape: f32[8,1], index: 2, kind: output, shape index: {}]  }
   0x1   :  { %v11_v0 = vld [vmem:[%s147_s0] sm:$0xff]  ;;  %110 = vset.pattern.permute.xlu0 %v117_v1 }
   0x2   :  { %v16_v2 = vsel %vm15_vm0, %v11_v0, -inf  ;;  %v13_v3 = vld [vmem:[%s148_s1] sm:$0xff]  ;;  %v41_v8 = vand.u32 127, %v40_v7  ;;  %v73_v34 = vshrl.u32 %v40_v7, 7 }
   0x3   :  { %17 = vmax.xlane.f32.xlu0 %v16_v2 }
   0x4   :  { %vm99_vm3 = vcmp.eq.s32.totalorder %v73_v34, 0 }
  0x19   :  { %43 = vperm.xlu0 %110, %v13_v3  }
  0x90   :  { %v18_v4 = vpop.xlane.xlu0 %17 }
  0x91   :  { %v22_v5 = vsub.f32 %v11_v0, %v18_v4 }
  0x93   :  { %v24_v6 = vmul.f32 1.442695, %v22_v5 }
  0x95   :  { %111 = vpow2.f32 %v24_v6 }
  0x98   :  { %v44_v9 = vpop.permute.xlu0 %43 }
  0x99   :  { %vm48_vm1 = vcmp.eq.s32.totalorder %v41_v8, %v44_v9 }
  0x9a   :  { %v50_v11 = vsel %vm48_vm1, %v11_v0, 0.0 }
  0x9b   :  { %v52_v13 = vsel %vm15_vm0, %v50_v11, 0.0 }
  0x9f   :  { %v112_v10 = vpop.eup %111 }
  0xa0   :  { %v28_v12 = vsel %vm15_vm0, %v112_v10, 0.0 }
  0xa1   :  { %29 = vadd.xlane.f32.xlu1 %v28_v12 }
  0xa5   :  { %53 = vadd.xlane.f32.xlu1 %v52_v13 }
 0x12e   :  { %v30_v14 = vpop.xlane.xlu1 %29 }
 0x12f   :  { %113 = vlog2.f32 %v30_v14 }
 0x132   :  { %v54_v17 = vpop.xlane.xlu1 %53 }
 0x139   :  { %v114_v15 = vpop.eup %113 }
 0x13a   :  { %v35_v16 = vmul.f32 0.6931472, %v114_v15 }
 0x13c   :  { %v38_v18 = vadd.f32 %v35_v16, %v18_v4 }
 0x13e   :  { %v58_v19 = vsub.f32 %v38_v18, %v54_v17 }
 0x140   :  { %v60_v20 = vsub.f32 0.0, %v58_v19 }
 0x142   :  { %v62_v21 = vmul.f32 1.442695, %v60_v20 }
 0x144   :  { %115 = vpow2.f32 %v62_v21 }
 0x14e   :  { %v116_v22 = vpop.eup %115 }
 0x14f   :  { %v66_v23 = vsub.f32 1.0, %v116_v22 }
 0x151   :  { %v68_v24 = vmul.f32 %v66_v23, %v66_v23 }
 0x153   :  { %v70_v25 = vmul.f32 %v68_v24, %v58_v19 }
 0x155   :  { %v84_v26 = vsel %vm83_vm2, %v70_v25, 0.0 }
 0x156   :  { %87 = vadd.xlane.f32.xlu1 %v84_v26 }
 0x1e3   :  { %v88_v27 = vpop.xlane.xlu1 %87 }
 0x1e4   :  { %v89_v28 = vrot.slane %v88_v27, 4 }
 0x1e6   :  { %v90_v29 = vadd.f32 %v89_v28, %v88_v27 }
 0x1e8   :  { %v91_v30 = vrot.slane %v90_v29, 2 }
 0x1ea   :  { %v92_v31 = vadd.f32 %v91_v30, %v90_v29 }
 0x1ec   :  { %v93_v32 = vrot.slane %v92_v31, 1 }
 0x1ee   :  { %v94_v33 = vadd.f32 %v93_v32, %v92_v31 }
 0x1f0   :  { %107 = vpush %v94_v33 }
 0x221   :  { %s108_s0 = spop %107 }
 0x222   :  { %s98_s1 = smul.f32 0.125, %s108_s0 }
 0x224   :  { %v100_v35 = vstv %s98_s1 }
 0x225   :  { %v101_v36 = vsel %vm99_vm3, %v100_v35, 0.0 }
 0x226   :  { %102 = vst.msk [vmem:[%s149_s2] sm:$0xff] %vm83_vm2, %v101_v36 }

</bundles_post_ra>
